<compile_context>
chip_gen: v6e
topology: v6e:2x2x1
jax: 0.10.0
libtpu: 0.0.40
codegen_flags: <defaults>
</compile_context>

<pallas_src>
import jax
import jax.numpy as jnp
from jax.experimental import pallas as pl
from jax.experimental.pallas import tpu as pltpu

EPS = 1e-5


# ----------------------------------------------------------------------------
# VMEM budgeting helpers (generation aware).
# ----------------------------------------------------------------------------
def _vmem_limit_bytes():
    """~3/4 of physical VMEM, capped at 96 MiB.
    v5e/v6e (128 MiB) -> 96 MiB limit; v7x (64 MiB) -> 48 MiB; unknown -> 48 MiB."""
    phys = 64 * 1024 * 1024  # conservative default (v7x per-core VMEM)
    try:
        phys = int(getattr(pltpu.get_tpu_info(), "vmem_capacity_bytes", phys))
    except Exception:
        pass
    return min(96 * 1024 * 1024, (phys * 3) // 4)


def _pick_tile_n(n_nodes, adj_chans, n_feats, n_filters, limit_bytes):
    """Largest row tile that divides N, is 16-aligned (bf16 sublane packing) or
    the full N, and whose full double-buffered VMEM footprint fits ~75% of the
    VMEM limit (A tile + conv tile + H + V + Wi + stats)."""
    budget = (limit_bytes * 3) // 4
    fixed = 2 * (adj_chans * n_nodes * n_filters * 2   # H  (bf16)
                 + n_nodes * n_feats * 2               # V  (bf16)
                 + n_feats * n_filters * 2             # W_i (bf16)
                 + 8 * n_filters * 4)                  # stats (f32)

    def fits(t):
        per_tile = 2 * (t * adj_chans * n_nodes * 2    # A tile (bf16)
                        + t * n_filters * 2)           # conv tile (bf16)
        return fixed + per_tile <= budget

    divisors = [t for t in range(1, n_nodes + 1) if n_nodes % t == 0]
    for align in (16, 8):
        for t in sorted((t for t in divisors if t % align == 0 or t == n_nodes),
                        reverse=True):
            if fits(t):
                return t
    return min(t for t in divisors if t % 8 == 0 or t == n_nodes)


def _pick_row_tile(rows, lane, budget_bytes=8 * 1024 * 1024):
    """Row tile for the streaming BN/ReLU pass (bf16 in + f32 out, 2x buffered)."""
    divisors = [t for t in range(1, rows + 1) if rows % t == 0]
    for t in sorted((t for t in divisors if t % 8 == 0 or t == rows), reverse=True):
        if 2 * t * lane * (2 + 4) <= budget_bytes:
            return t
    return min(t for t in divisors if t % 8 == 0 or t == rows)


# ----------------------------------------------------------------------------
# Kernel 1: graph convolution + per-batch BN partial statistics.
# ----------------------------------------------------------------------------
def _graph_conv_kernel(a_ref, h_ref, v_ref, wi_ref, conv_ref, stats_ref):
    """One (batch i, row-tile j) grid step.

    a_ref    : (1, tile_n, L*N) bf16  rows of A for this tile, (l, m)-flat cols
    h_ref    : (1, L*N, F)      bf16  H_b[l*N+m, f] = sum_c V_b[m,c] Wadj[l,c,f]
                                      (block index depends only on i -> resident)
    v_ref    : (1, N, C)        bf16  all node features of this batch (resident)
    wi_ref   : (C, F)           bf16
    conv_ref : (1, tile_n, F)   bf16  graph-conv output tile
    stats_ref: (1, 8, F)        f32   per-batch accumulator; row 0 = sum,
                                      row 1 = sum of squares, rows 2..7 = 0
    """
    j = pl.program_id(1)
    tile_n = a_ref.shape[1]
    n_filters = conv_ref.shape[2]

    # Two large MXU matmuls (bf16 operands, f32 accumulation):
    #   A_tile [tile_n, L*N] @ H_b [L*N, F]  +  V_tile [tile_n, C] @ W_i [C, F]
    out = jnp.dot(a_ref[0], h_ref[0], preferred_element_type=jnp.float32)
    start = pl.multiple_of(j * tile_n, tile_n)
    v_tile = v_ref[0, pl.ds(start, tile_n), :]
    out = out + jnp.dot(v_tile, wi_ref[...], preferred_element_type=jnp.float32)
    # NOTE: conv bias intentionally omitted -- a per-channel constant cancels
    # exactly in the training-mode BatchNorm (x - mean) that follows.
    conv_ref[0] = out.astype(conv_ref.dtype)

    # Per-batch BN partial statistics, accumulated across row tiles in the
    # resident stats output block (single HBM stats write per batch).  Stats
    # are recomputed from the stored tile so the f32 accumulator does not stay
    # live alongside x*x (keeps vreg pressure down at large tile_n x F).
    x = conv_ref[0].astype(jnp.float32)
    s = jnp.sum(x, axis=0, keepdims=True)                       # [1, F]
    ss = jnp.sum(x * x, axis=0, keepdims=True)                  # [1, F]
    row = jax.lax.broadcasted_iota(jnp.int32, (8, n_filters), 0)
    packed = jnp.where(row == 0, s, jnp.where(row == 1, ss, 0.0))

    @pl.when(j == 0)
    def _():
        stats_ref[0] = packed

    @pl.when(j > 0)
    def _():
        stats_ref[0] = stats_ref[0] + packed


# ----------------------------------------------------------------------------
# Kernel 2: fused BN affine + ReLU on lane-dense slabs.
# ----------------------------------------------------------------------------
def _bn_relu_kernel(x_ref, scale_ref, shift_ref, o_ref):
    """o = max(x * scale + shift, 0).  Elementwise math in f32 (v5e VPU has no
    bf16); bf16 is used for storage/matmul operands only."""
    y = x_ref[...].astype(jnp.float32) * scale_ref[...] + shift_ref[...]
    o_ref[...] = jnp.maximum(y, 0.0)


# ----------------------------------------------------------------------------
# Wrapper.
# ----------------------------------------------------------------------------
def gconv_block1(V, A, Wi, Wadj, bias, gamma, beta, *, eps=EPS):
    """GConvBlock1 forward with training-mode BatchNorm1d semantics.  The conv
    bias is a no-op under those semantics (cancels in x - mean) and is dropped.
    """
    del bias
    b, n_nodes, n_feats = V.shape
    n_adj = A.shape[2]
    n_filters = Wi.shape[1]

    # Wrapper-side layout plumbing & dtype casts (kernel is HBM-bound on A):
    #   A [b, N, L, N] -> A_flat [b, N, L*N]          (free contiguous reshape)
    #   H [b, L*N, F]  = stack_l(V_b @ Wadj_l)        (tiny einsum, f32 -> bf16)
    a_flat = A.reshape(b, n_nodes, n_adj * n_nodes).astype(jnp.bfloat16)
    h_flat = jnp.einsum('bnc,lcf->blnf', V, Wadj,
                        preferred_element_type=jnp.float32)
    h_flat = h_flat.reshape(b, n_adj * n_nodes, n_filters).astype(jnp.bfloat16)
    v_bf16 = V.astype(jnp.bfloat16)
    wi_bf16 = Wi.astype(jnp.bfloat16)

    vmem_limit = _vmem_limit_bytes()
    tile_n = _pick_tile_n(n_nodes, n_adj, n_feats, n_filters, vmem_limit)
    n_tiles = n_nodes // tile_n

    conv, stats = pl.pallas_call(
        _graph_conv_kernel,
        out_shape=(
            jax.ShapeDtypeStruct((b, n_nodes, n_filters), jnp.bfloat16),
            jax.ShapeDtypeStruct((b, 8, n_filters), jnp.float32),
        ),
        grid_spec=pltpu.PrefetchScalarGridSpec(
            num_scalar_prefetch=0,
            grid=(b, n_tiles),
            in_specs=[
                pl.BlockSpec((1, tile_n, n_adj * n_nodes), lambda i, j: (i, j, 0)),
                pl.BlockSpec((1, n_adj * n_nodes, n_filters), lambda i, j: (i, 0, 0)),
                pl.BlockSpec((1, n_nodes, n_feats), lambda i, j: (i, 0, 0)),
                pl.BlockSpec((n_feats, n_filters), lambda i, j: (0, 0)),
            ],
            out_specs=(
                pl.BlockSpec((1, tile_n, n_filters), lambda i, j: (i, j, 0)),
                pl.BlockSpec((1, 8, n_filters), lambda i, j: (i, 0, 0)),
            ),
        ),
        compiler_params=pltpu.CompilerParams(
            # Row-tile axis must stay 'arbitrary': the stats output block
            # accumulates across it.  (For v7x with b == 1, per-tile stats
            # blocks would let both axes be 'parallel' across the 2 TCs.)
            dimension_semantics=("parallel", "arbitrary"),
            vmem_limit_bytes=vmem_limit,
        ),
    )(a_flat, h_flat, v_bf16, wi_bf16)

    # Fold BN into one affine per channel (tiny [F]-sized math in plain JAX).
    count = float(b * n_nodes)
    mean = jnp.sum(stats[:, 0, :], axis=0) / count
    # TODO(synk): one-pass E[x^2]-E[x]^2 variance is cancellation-prone if the
    # conv output has a mean far larger than its spread; fine at these scales.
    var = jnp.maximum(jnp.sum(stats[:, 1, :], axis=0) / count - mean * mean, 0.0)
    scale = gamma * jax.lax.rsqrt(var + eps)
    shift = beta - mean * scale

    # Fused BN affine + ReLU, presented lane-dense (last dim 128) when F < 128
    # so the streaming pass issues unmasked full-lane stores.
    lane = 128
    total = b * n_nodes * n_filters
    if n_filters < lane and lane % n_filters == 0 and total % lane == 0:
        rep = lane // n_filters
        rows = total // lane
        x2 = conv.reshape(rows, lane)
        scale2 = jnp.tile(scale, rep).reshape(1, lane)
        shift2 = jnp.tile(shift, rep).reshape(1, lane)
    else:
        lane = n_filters
        rows = b * n_nodes
        x2 = conv.reshape(rows, lane)
        scale2 = scale.reshape(1, lane)
        shift2 = shift.reshape(1, lane)

    tile_r = _pick_row_tile(rows, lane)
    out2 = pl.pallas_call(
        _bn_relu_kernel,
        out_shape=jax.ShapeDtypeStruct((rows, lane), jnp.float32),
        grid_spec=pltpu.PrefetchScalarGridSpec(
            num_scalar_prefetch=0,
            grid=(rows // tile_r,),
            in_specs=[
                pl.BlockSpec((tile_r, lane), lambda i: (i, 0)),
                pl.BlockSpec((1, lane), lambda i: (0, 0)),
                pl.BlockSpec((1, lane), lambda i: (0, 0)),
            ],
            out_specs=pl.BlockSpec((tile_r, lane), lambda i: (i, 0)),
        ),
        compiler_params=pltpu.CompilerParams(
            dimension_semantics=("parallel",),
        ),
    )(x2, scale2, shift2)
    return out2.reshape(b, n_nodes, n_filters)


# ----------------------------------------------------------------------------
# References.
# ----------------------------------------------------------------------------
def reference_matched(V, A, Wi, Wadj, gamma, beta, eps=EPS):
    """Pure-JAX reference using the SAME bf16 operand/storage casts as the
    kernel path (f32 accumulation), training-mode BN.  Tight-tolerance check."""
    b, n_nodes, _ = V.shape
    n_adj = A.shape[2]
    n_filters = Wi.shape[1]
    a_flat = A.reshape(b, n_nodes, n_adj * n_nodes).astype(jnp.bfloat16)
    h = jnp.einsum('bnc,lcf->blnf', V, Wadj, preferred_element_type=jnp.float32)
    h_flat = h.reshape(b, n_adj * n_nodes, n_filters).astype(jnp.bfloat16)
    conv = jnp.einsum('bnk,bkf->bnf', a_flat, h_flat,
                      preferred_element_type=jnp.float32)
    conv = conv + jnp.einsum('bnc,cf->bnf', V.astype(jnp.bfloat16),
                             Wi.astype(jnp.bfloat16),
                             preferred_element_type=jnp.float32)
    x = conv.astype(jnp.bfloat16).astype(jnp.float32)   # bf16 HBM round trip
    mean = jnp.mean(x, axis=(0, 1))
    var = jnp.maximum(jnp.mean(x * x, axis=(0, 1)) - mean * mean, 0.0)
    scale = gamma * jax.lax.rsqrt(var + eps)
    shift = beta - mean * scale
    return jnp.maximum(x * scale + shift, 0.0)


def reference_f32(V, A, Wi, Wadj, bias, gamma, beta, eps=EPS):
    """Full-f32 replica of the PyTorch forward (training-mode BN)."""
    out = jnp.einsum('bnc,cf->bnf', V, Wi)
    for l in range(A.shape[2]):
        n_l = jnp.einsum('bnm,bmc->bnc', A[:, :, l, :], V)
        out = out + jnp.einsum('bnc,cf->bnf', n_l, Wadj[l])
    out = out + bias[None, None, :]
    mean = jnp.mean(out, axis=(0, 1), keepdims=True)
    var = jnp.mean((out - mean) ** 2, axis=(0, 1), keepdims=True)
    out = (out - mean) / jnp.sqrt(var + eps) * gamma + beta
    return jnp.maximum(out, 0.0)


def xavier_uniform(key, shape):
    fan_in, fan_out = shape[-2], shape[-1]
    bound = (6.0 / (fan_in + fan_out)) ** 0.5
    return jax.random.uniform(key, shape, jnp.float32, -bound, bound)


if __name__ == "__main__":
    # Small shapes consistent with the module: b=2 graphs, N=16 nodes,
    # C=8 input features, F=32 filters, L=4 adjacency channels.
    # (At these sizes the kernel is pure fixed overhead; the tiling/dtype
    #  choices are aimed at realistic N / L / F where the A stream dominates.)
    b, N, C, F, L = 2, 16, 8, 32, 4

    key = jax.random.PRNGKey(0)
    k_wi, k_wl, k_v, k_a = jax.random.split(key, 4)

    Wi = xavier_uniform(k_wi, (C, F))                 # weight_i
    Wadj = xavier_uniform(k_wl, (L, C, F))            # weight_list stacked
    bias = jnp.full((F,), 0.01, dtype=jnp.float32)    # bias.data.fill_(0.01)
    gamma = jnp.ones((F,), dtype=jnp.float32)         # BN weight
    beta = jnp.zeros((F,), dtype=jnp.float32)         # BN bias

    V = jax.random.normal(k_v, (b, N, C), dtype=jnp.float32)
    A = jax.random.uniform(k_a, (b, N, L, N), dtype=jnp.float32)

    out = jax.block_until_ready(gconv_block1(V, A, Wi, Wadj, bias, gamma, beta))
    assert out.shape == (b, N, F)

    # Primary check: reference with matching bf16 casts (tight tolerance).
    ref_bf16 = reference_matched(V, A, Wi, Wadj, gamma, beta)
    assert jnp.allclose(out, ref_bf16, atol=3e-2, rtol=3e-2), \
        "mismatch vs bf16-matched reference"

    # Sanity check vs the full-f32 PyTorch-equivalent forward (loose tolerance
    # absorbs bf16 rounding of the A/H/V/Wi operands and conv intermediate).
    ref_f32 = reference_f32(V, A, Wi, Wadj, bias, gamma, beta)
    assert jnp.allclose(out, ref_f32, atol=2e-1, rtol=1e-1), \
        "mismatch vs f32 reference"

    print("KERNEL_OK")
</pallas_src>

<mosaic_0001>
module attributes {stable_mosaic.version = 11 : i64} {
  func.func @_graph_conv_kernel(%arg0: i32, %arg1: i32, %arg2: memref<1x16x64xbf16, #tpu.memory_space<vmem>>, %arg3: memref<1x64x32xbf16, #tpu.memory_space<vmem>>, %arg4: memref<1x16x8xbf16, #tpu.memory_space<vmem>>, %arg5: memref<8x32xbf16, #tpu.memory_space<vmem>>, %arg6: memref<1x16x32xbf16, #tpu.memory_space<vmem>>, %arg7: memref<1x8x32xf32, #tpu.memory_space<vmem>>) attributes {dimension_semantics = [#tpu.dimension_semantics<parallel>, #tpu.dimension_semantics<arbitrary>], iteration_bounds = array<i64: 2, 1>, scalar_prefetch = 0 : i64, scratch_operands = 0 : i64, tpu.core_type = #tpu.core_type<tc>, window_params = [{transform_indices = @transform_0, window_bounds = array<i64: 1, 16, 64>}, {transform_indices = @transform_1, window_bounds = array<i64: 1, 64, 32>}, {transform_indices = @transform_2, window_bounds = array<i64: 1, 16, 8>}, {pipeline_mode = #tpu.pipeline_mode<synchronous>, transform_indices = @transform_3, window_bounds = array<i64: 8, 32>}, {transform_indices = @transform_4, window_bounds = array<i64: 1, 16, 32>}, {transform_indices = @transform_5, window_bounds = array<i64: 1, 8, 32>}]} {
    %c0 = arith.constant 0 : index
    %c0_0 = arith.constant 0 : index
    %c0_1 = arith.constant 0 : index
    %0 = vector.load %arg2[%c0, %c0_0, %c0_1] : memref<1x16x64xbf16, #tpu.memory_space<vmem>>, vector<1x16x64xbf16>
    %1 = vector.shape_cast %0 : vector<1x16x64xbf16> to vector<16x64xbf16>
    %c0_2 = arith.constant 0 : index
    %c0_3 = arith.constant 0 : index
    %c0_4 = arith.constant 0 : index
    %2 = vector.load %arg3[%c0_2, %c0_3, %c0_4] : memref<1x64x32xbf16, #tpu.memory_space<vmem>>, vector<1x64x32xbf16>
    %3 = vector.shape_cast %2 : vector<1x64x32xbf16> to vector<64x32xbf16>
    %cst = arith.constant dense<0.000000e+00> : vector<16x32xf32>
    %4 = tpu.matmul %1, %3, %cst {dimension_numbers = #tpu.dot_dimension_numbers<[1], [0], [0], [1], [0, 0, 1, 1], [], []>} : vector<16x64xbf16>, vector<64x32xbf16>, vector<16x32xf32> -> vector<16x32xf32>
    %c16_i32 = arith.constant 16 : i32
    %5 = arith.muli %arg1, %c16_i32 : i32
    %6 = tpu.assume_multiple %5, 16 : i32
    %c0_5 = arith.constant 0 : index
    %7 = arith.index_cast %6 : i32 to index
    %c0_6 = arith.constant 0 : index
    %8 = vector.load %arg4[%c0_5, %7, %c0_6] : memref<1x16x8xbf16, #tpu.memory_space<vmem>>, vector<1x16x8xbf16>
    %9 = vector.shape_cast %8 : vector<1x16x8xbf16> to vector<16x8xbf16>
    %c0_7 = arith.constant 0 : index
    %c0_8 = arith.constant 0 : index
    %10 = vector.load %arg5[%c0_7, %c0_8] : memref<8x32xbf16, #tpu.memory_space<vmem>>, vector<8x32xbf16>
    %cst_9 = arith.constant dense<0.000000e+00> : vector<16x32xf32>
    %11 = tpu.matmul %9, %10, %cst_9 {dimension_numbers = #tpu.dot_dimension_numbers<[1], [0], [0], [1], [0, 0, 1, 1], [], []>} : vector<16x8xbf16>, vector<8x32xbf16>, vector<16x32xf32> -> vector<16x32xf32>
    %12 = arith.addf %4, %11 : vector<16x32xf32>
    %13 = arith.truncf %12 : vector<16x32xf32> to vector<16x32xbf16>
    %c0_10 = arith.constant 0 : index
    %c0_11 = arith.constant 0 : index
    %c0_12 = arith.constant 0 : index
    %14 = vector.load %arg6[%c0_10, %c0_11, %c0_12] : memref<1x16x32xbf16, #tpu.memory_space<vmem>>, vector<1x16x32xbf16>
    %15 = vector.shape_cast %14 : vector<1x16x32xbf16> to vector<16x32xbf16>
    %16 = vector.shape_cast %13 : vector<16x32xbf16> to vector<1x16x32xbf16>
    tpu.vector_store %arg6[%c0_10, %c0_11, %c0_12], %16 {strides = array<i32>} : memref<1x16x32xbf16, #tpu.memory_space<vmem>>, vector<1x16x32xbf16>,
    %c0_13 = arith.constant 0 : index
    %c0_14 = arith.constant 0 : index
    %c0_15 = arith.constant 0 : index
    %17 = vector.load %arg6[%c0_13, %c0_14, %c0_15] : memref<1x16x32xbf16, #tpu.memory_space<vmem>>, vector<1x16x32xbf16>
    %18 = vector.shape_cast %17 : vector<1x16x32xbf16> to vector<16x32xbf16>
    %19 = arith.extf %18 : vector<16x32xbf16> to vector<16x32xf32>
    %cst_16 = arith.constant dense<0.000000e+00> : vector<32xf32>
    %20 = vector.multi_reduction <add>, %19, %cst_16 [0] : vector<16x32xf32> to vector<32xf32>
    %21 = vector.shape_cast %20 : vector<32xf32> to vector<1x32xf32>
    %22 = arith.mulf %19, %19 : vector<16x32xf32>
    %cst_17 = arith.constant dense<0.000000e+00> : vector<32xf32>
    %23 = vector.multi_reduction <add>, %22, %cst_17 [0] : vector<16x32xf32> to vector<32xf32>
    %24 = vector.shape_cast %23 : vector<32xf32> to vector<1x32xf32>
    %25 = tpu.iota {dimensions = array<i32: 0>} : vector<8x32xi32>
    %c0_i32 = arith.constant 0 : i32
    %26 = vector.broadcast %c0_i32 : i32 to vector<8x32xi32>
    %27 = arith.cmpi eq, %25, %26 : vector<8x32xi32>
    %c1_i32 = arith.constant 1 : i32
    %28 = vector.broadcast %c1_i32 : i32 to vector<8x32xi32>
    %29 = arith.cmpi eq, %25, %28 : vector<8x32xi32>
    %cst_18 = arith.constant 0.000000e+00 : f32
    %30 = vector.shape_cast %24 : vector<1x32xf32> to vector<1x32xf32>
    %31 = vector.broadcast %30 : vector<1x32xf32> to vector<8x32xf32>
    %32 = vector.broadcast %cst_18 : f32 to vector<8x32xf32>
    %33 = arith.select %29, %31, %32 : vector<8x32xi1>, vector<8x32xf32>
    %34 = vector.shape_cast %21 : vector<1x32xf32> to vector<1x32xf32>
    %35 = vector.broadcast %34 : vector<1x32xf32> to vector<8x32xf32>
    %36 = arith.select %27, %35, %33 : vector<8x32xi1>, vector<8x32xf32>
    %c0_i32_19 = arith.constant 0 : i32
    %37 = arith.cmpi eq, %arg1, %c0_i32_19 : i32
    %38 = arith.extui %37 : i1 to i32
    %c0_i32_20 = arith.constant 0 : i32
    %39 = arith.cmpi ne, %38, %c0_i32_20 : i32
    scf.if %39 {
      %c0_23 = arith.constant 0 : index
      %c0_24 = arith.constant 0 : index
      %c0_25 = arith.constant 0 : index
      %43 = vector.load %arg7[%c0_23, %c0_24, %c0_25] : memref<1x8x32xf32, #tpu.memory_space<vmem>>, vector<1x8x32xf32>
      %44 = vector.shape_cast %43 : vector<1x8x32xf32> to vector<8x32xf32>
      %45 = vector.shape_cast %36 : vector<8x32xf32> to vector<1x8x32xf32>
      tpu.vector_store %arg7[%c0_23, %c0_24, %c0_25], %45 {strides = array<i32>} : memref<1x8x32xf32, #tpu.memory_space<vmem>>, vector<1x8x32xf32>,
    } else {
    }
    %c0_i32_21 = arith.constant 0 : i32
    %40 = arith.cmpi sgt, %arg1, %c0_i32_21 : i32
    %41 = arith.extui %40 : i1 to i32
    %c0_i32_22 = arith.constant 0 : i32
    %42 = arith.cmpi ne, %41, %c0_i32_22 : i32
    scf.if %42 {
      %c0_23 = arith.constant 0 : index
      %c0_24 = arith.constant 0 : index
      %c0_25 = arith.constant 0 : index
      %43 = vector.load %arg7[%c0_23, %c0_24, %c0_25] : memref<1x8x32xf32, #tpu.memory_space<vmem>>, vector<1x8x32xf32>
      %44 = vector.shape_cast %43 : vector<1x8x32xf32> to vector<8x32xf32>
      %45 = arith.addf %44, %36 : vector<8x32xf32>
      %c0_26 = arith.constant 0 : index
      %c0_27 = arith.constant 0 : index
      %c0_28 = arith.constant 0 : index
      %46 = vector.load %arg7[%c0_26, %c0_27, %c0_28] : memref<1x8x32xf32, #tpu.memory_space<vmem>>, vector<1x8x32xf32>
      %47 = vector.shape_cast %46 : vector<1x8x32xf32> to vector<8x32xf32>
      %48 = vector.shape_cast %45 : vector<8x32xf32> to vector<1x8x32xf32>
      tpu.vector_store %arg7[%c0_26, %c0_27, %c0_28], %48 {strides = array<i32>} : memref<1x8x32xf32, #tpu.memory_space<vmem>>, vector<1x8x32xf32>,
    } else {
    }
    return
  }
  func.func @transform_0(%arg0: i32, %arg1: i32) -> (i32, i32, i32) {
    %c0_i32 = arith.constant 0 : i32
    %c0_i32_0 = arith.constant 0 : i32
    return %arg0, %arg1, %c0_i32 : i32, i32, i32
  }
  func.func @transform_1(%arg0: i32, %arg1: i32) -> (i32, i32, i32) {
    %c0_i32 = arith.constant 0 : i32
    %c0_i32_0 = arith.constant 0 : i32
    %c0_i32_1 = arith.constant 0 : i32
    return %arg0, %c0_i32, %c0_i32_0 : i32, i32, i32
  }
  func.func @transform_2(%arg0: i32, %arg1: i32) -> (i32, i32, i32) {
    %c0_i32 = arith.constant 0 : i32
    %c0_i32_0 = arith.constant 0 : i32
    %c0_i32_1 = arith.constant 0 : i32
    return %arg0, %c0_i32, %c0_i32_0 : i32, i32, i32
  }
  func.func @transform_3(%arg0: i32, %arg1: i32) -> (i32, i32) {
    %c0_i32 = arith.constant 0 : i32
    %c0_i32_0 = arith.constant 0 : i32
    %c0_i32_1 = arith.constant 0 : i32
    return %c0_i32, %c0_i32_0 : i32, i32
  }
  func.func @transform_4(%arg0: i32, %arg1: i32) -> (i32, i32, i32) {
    %c0_i32 = arith.constant 0 : i32
    %c0_i32_0 = arith.constant 0 : i32
    return %arg0, %arg1, %c0_i32 : i32, i32, i32
  }
  func.func @transform_5(%arg0: i32, %arg1: i32) -> (i32, i32, i32) {
    %c0_i32 = arith.constant 0 : i32
    %c0_i32_0 = arith.constant 0 : i32
    %c0_i32_1 = arith.constant 0 : i32
    return %arg0, %c0_i32, %c0_i32_0 : i32, i32, i32
  }
}

</mosaic_0001>

<bundles_post_ra>
// kernel: tpu_custom_call.1
= control target key start
LH: loop header
LB: loop body
LE: loop exit
PB: predicated region body
PF: predicated region fallthrough
CT: control target
= control target key end

     0   :  { %11 = vsyncpa [#allocation3], 0  ;;  %s1123_s0 = inlined_call_operand.vmem [shape: bf16[2,16,64], index: 0, kind: input, shape index: {}]   ;;  %s1124_s1 = inlined_call_operand.vmem [shape: bf16[2,64,32], index: 1, kind: input, shape index: {}]   ;;  %s1125_s2 = inlined_call_operand.vmem [shape: bf16[2,16,8], index: 2, kind: input, shape index: {}]   ;;  %s1126_s3 = inlined_call_operand.vmem [shape: bf16[8,32], index: 3, kind: input, shape index: {}]   ;;  %s1127_s4 = inlined_call_operand.hbm [shape: bf16[2,16,32], index: 4, kind: output, shape index: {0}]   ;;  %s1128_s5 = inlined_call_operand.hbm [shape: f32[2,8,32], index: 5, kind: output, shape index: {1}]  }
   0x1   :  { %13 = vsyncpa [#allocation3 + $0x1], 0 }
   0x2   :  { %14 = vsyncpa [#allocation5], 0 }
   0x3   :  { %16 = vsyncpa [#allocation5 + $0x1], 0  ;;  %s956_s18 = smov 0   ;;  %s958_s19 = smov 0  }
   0x4   :  { %s960_s20 = smov 0   ;;  %s962_s21 = smov 0  }
   0x5   :  { %s964_s22 = smov 0   ;;  %s966_s23 = smov 0  }
   0x6 LB: > { %s677_s24 = sadd.s32 4294967295, %s918_s23   ;;  %s678_s25 = sadd.s32 4294967294, %s918_s23   ;;  %s918_s23 = sphi %s966_s23, %s22_s23   ;;  %s914_s22 = sphi %s964_s22, %s1137_s22   ;;  %s910_s21 = sphi %s962_s21, %s1136_s21   ;;  %s906_s20 = sphi %s960_s20, %s1135_s20   ;;  %s902_s19 = sphi %s958_s19, %s1134_s19   ;;  %s898_s18 = sphi %s956_s18, %s1133_s18  }
   0x7   : > { %s34_s26 = sadd.s32 1, %s914_s22  ;;  %s144_s27 = sadd.s32 1, %s906_s20 }
   0x8   : > { %p36_p0 = scmp.ge.s32.totalorder %s34_s26, 2  ;;  %p154_p1 = scmp.ne.s32.totalorder %s906_s20, %s902_s19 }
   0x9   : > { %p155_p2 = scmp.eq.s32.totalorder %s677_s24, 1  ;;  %p160_p3 = scmp.ne.s32.totalorder %s902_s19, %s898_s18 }
   0xa   : > { %s1139_s26 = smov (%p36_p0, %s34_s26), 0  ;;  %p161_p5 = scmp.eq.s32.totalorder %s678_s25, 1 }
   0xb   : > { %p996_p4 = por %p155_p2, %p154_p1  ;;  %s139_s29 = ssub.s32 %s914_s22, %s1139_s26 }
   0xc   : > { %p681_p6 = scmp.ge.s32.totalorder %s918_s23, 1  ;;  %p142_p7 = scmp.eq.s32.totalorder %s139_s29, 0 }
   0xd   : > { %p1003_p8 = por %p161_p5, %p160_p3  ;;  %p237_p9 = scmp.lt.s32.totalorder %s918_s23, 3 }
   0xe   : > { %s1009_s6 = scalar_select %p142_p7, %s906_s20, %s144_s27  }
   0xf   : > { %p238_p10 = pnand %p681_p6, %p237_p9 }
  0x10   : > { %p285_p11 = scmp.lt.s32.totalorder (!%p238_p10), %s910_s21, 1  ;;  %s1026_s29 = sand.u32 (!%p238_p10), 1, %s902_s19  }
  0x11   : > { %241 = sbr.rel (%p238_p10) target bundleno = 290 (0x122), region = 36  ;;  %s682_s7 = sshll.u32 (!%p238_p10), %s1026_s29, 3 }
  0x12   : > { %s1129_s8 = sshll.u32 (!%p238_p10), %s910_s21, 7  ;;  %s922_s16 = smov (!%p238_p10), [#allocation2]  }
  0x13   : > { %s1041_s13 = scalar_lea.hbm (!%p238_p10), %s1127_s4, %s1129_s8 }
  0x16   : > { %v323_v0 = vld [vmem:[%s1126_s3] sm:$0xf]  ;;  %vm333_vm0 = vcmask 1043456   ;;  %v920_v1 = vmov 0.0   ;;  %s286_s9 = scalar_select %p285_p11, %s910_s21, 1  ;;  %vm921_vm1 = vmmov 0  }
  0x17   : > { %730 = vmatprep.subr.bf16.mxu1 %v920_v1  ;;  %724 = vmatprep.subr.bf16.mxu0 %v920_v1  ;;  %v335_v2 = vsel %vm333_vm0, %v323_v0, 0  ;;  %vm329_vm2 = vcmask 64512   ;;  %vm407_vm3 = vcmask 523264   ;;  %vm460_vm4 = vcmask 257024  }
  0x18   : > { %725 = vmatpush3.bf16.msra.mxu0 %v335_v2  ;;  %726 = vmatprep.mubr.msk.bf16.mxu0 %vm921_vm1, %v920_v1  ;;  %s708_s10 = sshll.u32 %s286_s9, 5  ;;  %s707_s11 = sshll.u32 %s286_s9, 3 }
  0x19   : > { %738 = vmatprep.mubr.msk.bf16.mxu1 %vm921_vm1, %v920_v1  ;;  %s298_s14 = scalar_lea.vmem %s1124_s1, %s708_s10  ;;  %s303_s17 = scalar_lea.vmem %s1125_s2, %s707_s11 }
  0x1a   : > { %v806_v3 = vld [vmem:[%s298_s14 + $0x18] sm:$0xff]   ;;  %v807_v4 = vld [vmem:[%s298_s14 + $0x10] sm:$0xff]   ;;  %v809_v5 = vld [vmem:[%s303_s17] sm:$0xff]   ;;  %s292_s27 = scalar_lea.vmem %s1123_s0, %s707_s11  ;;  %s1032_s9 = scalar_lea.vmem [#allocation2], %s682_s7 }
  0x1b   : > { %731 = vmatpush3.bf16.msra.mxu1 %v806_v3  ;;  %727 = vmatmul.mubr.msk.bf16.vlgmr.msra.gmra.mxu0 %vm329_vm2, %v809_v5  ;;  %v808_v6 = vld [vmem:[%s298_s14 + $0x8] sm:$0xff]   ;;  %v810_v7 = vld [vmem:[%s298_s14] sm:$0xff]   ;;  %s527_s10 = sshll.u32 %s1032_s9, 4  ;;  %s507_s14 = scalar_lea.sflag [#allocation3], %s1026_s29  ;;  %s1043_s10 = int_to_ptr.vmem [resolvable:$true] %s527_s10 }
  0x1c   : > { %732 = vmatprep.subr.bf16.mxu1 %v920_v1  ;;  %v811_v8 = vld [vmem:[%s292_s27] sm:$0xff]   ;;  %s812_s15 = scalar_lea.vmem %s1043_s10, 128  ;;  %s816_s17 = sshll.u32 %s922_s16, 4  ;;  %s817_s17 = int_to_ptr.vmem [resolvable:$false] %s816_s17 }
  0x1d   : > { %p813_p12 = scmp.ne.s32.totalorder %s1043_s10, %s812_s15  ;;  %s818_s24 = scalar_lea.vmem %s817_s17, 256 }
  0x1e   : > { %p819_p1 = scmp.lt.s32.totalorder %s1043_s10, %s817_s17  ;;  %p820_p2 = scmp.lt.s32.totalorder %s818_s24, %s812_s15 }
  0x1f   : > { %733 = vmatpush3.bf16.msra.mxu1 %v807_v4  ;;  %p814_p13 = pnand %p813_p12, %p996_p4 }
  0x20   : > { %734 = vmatprep.subr.bf16.mxu1 %v920_v1  ;;  %p821_p3 = por %p820_p2, %p819_p1 }
  0x21   : > { %p815_p0 = pneg %p814_p13 }
  0x23   : > { %735 = vmatpush3.bf16.msra.mxu1 %v808_v6  ;;  %p822_p5 = pnand %p821_p3, %p815_p0 }
  0x24   : > { %736 = vmatprep.subr.bf16.mxu1 %v920_v1 }
  0x27   : > { %737 = vmatpush3.bf16.msra.mxu1 %v810_v7 }
  0x2a   : > { %739 = vmatmul.mubr.msk.bf16.vlgmr.msra.gmra.mxu1 %vm407_vm3, %v811_v8 }
  0xdb   : > { %v371_v9 = vpop.f32.mrf.mxu0 }
  0xdd   : > { %v728_v10 = vpop.f32.mrf.mxu0 }
  0xdf   : > { %v374_v11 = vpop.f32.mrf.mxu0 }
  0xe1   : > { %v729_v12 = vpop.f32.mrf.mxu0 }
  0xea   : > { %v445_v13 = vpop.f32.mrf.mxu1 }
  0xeb   : > { %v446_v14 = vadd.f32 %v445_v13, %v371_v9 }
  0xec   : > { %v740_v15 = vpop.f32.mrf.mxu1 }
  0xed   : > { %v710_v16 = vpack.c.bf16 %v446_v14, %v446_v14 }
  0xee   : > { %v448_v17 = vpop.f32.mrf.mxu1 }
  0xef   : > { %461 = vst.msk [vmem:[%s1032_s9] sm:$0xf] %vm460_vm4, %v710_v16  ;;  %v449_v18 = vadd.f32 %v448_v17, %v374_v11 }
  0xf0   : > { %v741_v19 = vpop.f32.mrf.mxu1 }
  0xf1   : > { %v711_v20 = vpack.c.bf16 %v449_v18, %v449_v18 }
  0xf3   : > { %462 = vst.msk [vmem:[%s1032_s9 + $0x4] sm:$0xf] %vm460_vm4, %v711_v20 }
  0xf4   : > { %825 = shalt.err (!%p822_p5)
}
  0xf5   : > { %s826_s25 = scalar_lea.hbm %s1041_s13, 128  ;;  %s830_s12 = scalar_lea.hbm %s1127_s4, 256 }
  0xf6   : > { %p827_p6 = scmp.ne.s32.totalorder %s1041_s13, %s826_s25  ;;  %p831_p10 = scmp.lt.s32.totalorder %s1041_s13, %s1127_s4 }
  0xf7   : > { %p832_p11 = scmp.lt.s32.totalorder %s830_s12, %s826_s25 }
  0xf8   : > { %p828_p7 = pnand %p827_p6, %p996_p4 }
  0xf9   : > { %p833_p12 = por %p832_p11, %p831_p10 }
  0xfa   : > { %p829_p9 = pneg %p828_p7 }
  0xfc   : > { %p834_p13 = pnand %p833_p12, %p829_p9 }
  0xfe   : > { %837 = shalt.err (!%p834_p13)
}
  0xff   : > { %s923_s15 = smov 64   ;;  %s924_s17 = smov 4   ;;  %v714_v21 = vld [vmem:[%s1032_s9] sm:$0xff]   ;;  %vm467_vm5 = vcmask 261120   ;;  %v488_v35 = vlaneseq }
 0x100   : > { %742 = dma.vmem_to_hbm [thread:$0]  (%p996_p4), %s1043_s10, 128, %s1041_s13, %s507_s14, %s923_s15, %s923_s15, %s924_s17   ;;  %v715_v22 = vunpack.c.l.bf16 %v714_v21  ;;  %v716_v23 = vunpack.c.h.bf16 %v714_v21 }
 0x101   : > { %v489_v40 = vshrl.u32 %v488_v35, 7  ;;  %s283_s8 = scalar_lea.vmem [#allocation4], %s682_s7  ;;  %s1132_s10 = sshll.u32 %s910_s21, 7 }
 0x102   : > { %v468_v24 = vsel %vm467_vm5, %v715_v22, 0.0  ;;  %v469_v25 = vsel %vm467_vm5, %v716_v23, 0.0  ;;  %v477_v26 = vmul.f32 %v715_v22, %v715_v22  ;;  %v478_v27 = vmul.f32 %v716_v23, %v716_v23  ;;  %s543_s9 = sshll.u32 %s283_s8, 4  ;;  %s1081_s24 = scalar_lea.hbm %s1128_s5, %s1132_s10  ;;  %s544_s9 = int_to_ptr.vmem [resolvable:$true] %s543_s9 }
 0x103   : > { %v470_v28 = vadd.f32 %v469_v25, %v468_v24  ;;  %vm491_vm6 = vcmp.eq.s32.totalorder %v489_v40, 1  ;;  %vm490_vm7 = vcmp.eq.s32.totalorder %v489_v40, 0  ;;  %s512_s25 = scalar_lea.sflag [#allocation5], %s1026_s29  ;;  %s838_s27 = scalar_lea.vmem %s544_s9, 128 }
 0x104   : > { %v479_v29 = vsel %vm467_vm5, %v477_v26, 0.0  ;;  %v480_v30 = vsel %vm467_vm5, %v478_v27, 0.0  ;;  %p839_p0 = scmp.ne.s32.totalorder %s544_s9, %s838_s27  ;;  %s925_s7 = smov [#allocation4]  }
 0x105   : > { %v471_v31 = vrot.slane %v470_v28, 4  ;;  %v481_v32 = vadd.f32 %v480_v30, %v479_v29  ;;  %s842_s11 = sshll.u32 %s925_s7, 4  ;;  %s843_s11 = int_to_ptr.vmem [resolvable:$false] %s842_s11 }
 0x106   : > { %p840_p1 = pnand %p839_p0, %p996_p4  ;;  %s844_s12 = scalar_lea.vmem %s843_s11, 256 }
 0x107   : > { %v472_v33 = vadd.f32 %v471_v31, %v470_v28  ;;  %v482_v34 = vrot.slane %v481_v32, 4  ;;  %p845_p3 = scmp.lt.s32.totalorder %s544_s9, %s843_s11  ;;  %p846_p5 = scmp.lt.s32.totalorder %s844_s12, %s838_s27 }
 0x108   : > { %p841_p2 = pneg %p840_p1 }
 0x109   : > { %v473_v36 = vrot.slane %v472_v33, 2  ;;  %v483_v37 = vadd.f32 %v482_v34, %v481_v32  ;;  %p847_p6 = por %p846_p5, %p845_p3 }
 0x10b   : > { %v474_v38 = vadd.f32 %v473_v36, %v472_v33  ;;  %v484_v39 = vrot.slane %v483_v37, 2  ;;  %p848_p7 = pnand %p847_p6, %p841_p2 }
 0x10d   : > { %v485_v41 = vadd.f32 %v484_v39, %v483_v37  ;;  %v475_v42 = vrot.slane %v474_v38, 1 }
 0x10f   : > { %v486_v43 = vrot.slane %v485_v41, 1  ;;  %v476_v45 = vadd.f32 %v475_v42, %v474_v38 }
 0x111   : > { %v487_v44 = vadd.f32 %v486_v43, %v485_v41 }
 0x113   : > { %v492_v46 = vsel %vm491_vm6, %v487_v44, 0.0 }
 0x114   : > { %v493_v47 = vsel %vm490_vm7, %v476_v45, %v492_v46 }
 0x115   : > { %498 = vst.msk [vmem:[%s283_s8] sm:$0xff] %vm467_vm5, %v493_v47 }
 0x116   : > { %851 = shalt.err (!%p848_p7)
}
 0x117   : > { %s852_s21 = scalar_lea.hbm %s1081_s24, 128  ;;  %s856_s15 = scalar_lea.hbm %s1128_s5, 256 }
 0x118   : > { %p853_p9 = scmp.ne.s32.totalorder %s1081_s24, %s852_s21  ;;  %p857_p12 = scmp.lt.s32.totalorder %s1081_s24, %s1128_s5 }
 0x119   : > { %p858_p13 = scmp.lt.s32.totalorder %s856_s15, %s852_s21 }
 0x11a   : > { %p854_p10 = pnand %p853_p9, %p996_p4 }
 0x11b   : > { %p859_p0 = por %p858_p13, %p857_p12 }
 0x11c   : > { %p855_p11 = pneg %p854_p10 }
 0x11e   : > { %p860_p1 = pnand %p859_p0, %p855_p11 }
 0x120   : > { %863 = shalt.err (!%p860_p1)
}
 0x121   : > { %743 = dma.vmem_to_hbm [thread:$0]  (%p996_p4), %s544_s9, 128, %s1081_s24, %s512_s25  }
 0x122 PF: > { %p753_p2 = scmp.ge.s32.totalorder %s918_s23, 2  ;;  %s555_s10 = sand.u32 1, %s898_s18  }
 0x123   : > { %s556_s13 = scalar_lea.sflag [#allocation3], %s555_s10 }
 0x124   : > { %p747_p3 = pnand %p753_p2, %p1003_p8 }
 0x126   : > { %p748_p5 = pneg %p747_p3 }
 0x128   : > { %889 = dma.done.wait (%p748_p5), %s556_s13, 128  }
 0x129   : > { %891 = vsyncadd (%p748_p5), %s556_s13, 4294967168  ;;  %s565_s14 = scalar_lea.sflag [#allocation5], %s555_s10 }
 0x12a   : > { %893 = dma.done.wait (%p748_p5), %s565_s14, 128  }
 0x12b   : > { %895 = vsyncadd (%p748_p5), %s565_s14, 4294967168  ;;  %s22_s23 = sadd.s32 1, %s918_s23   ;;  %s1133_s18 = smov %s902_s19 }
 0x12c   : > { %p19_p6 = scmp.ge.s32.totalorder %s22_s23, 4   ;;  %s1134_s19 = smov %s906_s20 }
 0x12d   : > { %s1135_s20 = smov %s1009_s6  ;;  %s1136_s21 = smov %s914_s22 }
 0x12e   : > { %s1137_s22 = smov %s1139_s26  ;;  %21 = sbr.rel (!%p19_p6) target bundleno = 6 (0x6), region = 103 }
 0x133   :  { %570 = vsyncpa [#allocation3], 1 }
 0x134   :  { %572 = vsyncpa [#allocation3 + $0x1], 1 }
 0x135   :  { %573 = vsyncpa [#allocation5], 1 }
 0x136   :  { %575 = vsyncpa [#allocation5 + $0x1], 1 }

</bundles_post_ra>
